<compile_context>
chip_gen: v5e
topology: v5e:2x2
jax: 0.10.0
libtpu: 0.0.40
codegen_flags: <defaults>
</compile_context>

<pallas_src>
import functools

import jax
import jax.numpy as jnp
from jax.experimental import pallas as pl
from jax.experimental.pallas import tpu as pltpu


# ---------------------------------------------------------------------------
# Kernel A (prep): Eq. 3 closed form, (N, T) orientation only, tiled over rows.
#   pt[n, k] = Pt[n, k] + eps/T
#   Pt[:, k] = delta[:, k+1] * prod_{s=1..k}(1 - delta[:, s])   for k < T-1
#   Pt[:, T-1] =               prod_{s=1..T-1}(1 - delta[:, s])
# i.e. Pt[:, k] = cp[:, k] * dnext[:, k], with dnext = delta shifted left by one
# column and its last column set to 1 (built in the wrapper).
# ---------------------------------------------------------------------------
def _pt_prep_kernel(mask_ref, d_ref, dnext_ref, pt_ref, *, T, epsilon):
    f32 = jnp.float32
    eps_over_T = epsilon / T

    d = d_ref[...]                                                    # (block, T) f32
    col = jax.lax.broadcasted_iota(jnp.int32, d.shape, 1)
    # prod runs over s = 1..k, so column 0 contributes log(1) = 0.
    lg = jnp.log(jnp.maximum(jnp.where(col == 0, 1.0, 1.0 - d), 1e-30))

    # Exact bf16 hi/lo split -> two single-pass MXU dots accumulated in f32.
    hi = lg.astype(jnp.bfloat16)
    lo = (lg - hi.astype(f32)).astype(jnp.bfloat16)
    m = mask_ref[...]                                                 # (T, T) bf16 0/1
    s = (jnp.dot(hi, m, preferred_element_type=f32)
         + jnp.dot(lo, m, preferred_element_type=f32))                # inclusive prefix sum
    cp = jnp.exp(s)                                                   # prod_{s<=k}(1-d)

    pt_ref[...] = cp * dnext_ref[...] + eps_over_T                    # telescoped Pt


# ---------------------------------------------------------------------------
# Kernel B (streaming): one independent row-block of the two reductions.
# ---------------------------------------------------------------------------
def _stream_kernel(l_ref, yp_ref, pt_ref, mt_ref, out_ref, *, num_classes):
    """l_ref  : (C, B, N)  log-probs for time rows of this block, batch on lanes
       yp_ref : (B, N)     true class ids (already permuted to (T, N))
       pt_ref : (B, T)     Pt + eps/T rows                 (classification term)
       mt_ref : (B, N)     rows of transpose(pt) * (1 - n/T), n = batch-lane index
                           under the reference's positional T == N mixing
       out_ref: (1, 8, 128) partial sums: [0,0,0] = classification, [0,1,0] = earliness
    """
    f32 = jnp.float32
    yp = yp_ref[...]
    # True-class log-prob via a pure select chain in the stream dtype (exactly one
    # class matches per element, so no adds and no 0 * -inf); upcast once.
    # TODO(synk): if C ever grows large (>=32), move this loop onto a second
    #             'arbitrary' grid axis with a VMEM scratch accumulator.
    g = l_ref[0]
    for cls in range(1, num_classes):
        g = jnp.where(yp == cls, l_ref[cls], g)
    g = g.astype(f32)

    class_part = -jnp.sum(g * pt_ref[...])             # NLL * Pt   (positional, T == N)
    earl_part = jnp.sum(jnp.exp(g) * mt_ref[...])      # exp(logp) * Pt^T * weight

    sub = jax.lax.broadcasted_iota(jnp.int32, (8, 128), 0)
    lane = jax.lax.broadcasted_iota(jnp.int32, (8, 128), 1)
    tile = jnp.where((sub == 0) & (lane == 0), class_part,
                     jnp.where((sub == 1) & (lane == 0), earl_part, 0.0))
    out_ref[0] = tile                                   # lane-dense (8, 128) store


def _pick_block_rows(rows, max_rows, align=8):
    """Largest multiple of `align` that divides `rows` and is <= max_rows.
    Falls back to the full extent when `rows` is not `align`-divisible."""
    if rows % align != 0:
        return rows
    b = min(int(max_rows), rows)
    b = max(align, (b // align) * align)
    while rows % b != 0:
        b -= align
    return b


def early_reward_loss(log_class_probabilities, probability_stopping, y_true,
                      alpha=0.5, epsilon=10.0, stream_dtype=jnp.bfloat16,
                      block_rows=256):
    """Forward pass of EarlyRewardLoss; returns the scalar loss.

    log_class_probabilities : (T, N, C) float  (log-softmax outputs)
    probability_stopping    : (N, T)    float
    y_true                  : (N, T)    int
    """
    T, N, C = log_class_probabilities.shape
    assert probability_stopping.shape == (N, T)
    assert y_true.shape == (N, T)
    # The reference module mixes (T, N) and (N, T) tensors positionally; it only
    # works when T == N, which we reproduce exactly.
    assert T == N, "EarlyRewardLoss (as written in the reference) requires T == N"
    rows = T                                  # shared row axis of the (R, R) products

    vmem_limit = 32 * 1024 * 1024             # >= v5e's 16 MiB default, <= v7x physical

    # Layout glue (a production producer should emit these layouts directly).
    l_ctn = jnp.transpose(log_class_probabilities, (2, 0, 1)).astype(stream_dtype)  # (C, T, N)
    yp = jnp.transpose(y_true, (1, 0)).astype(jnp.int32)                            # (T, N)
    delta = probability_stopping.astype(jnp.float32)                                # (N, T)
    # delta shifted left by one column, last column = 1 (telescoped Pt multiplier).
    d_next = jnp.concatenate(
        [delta[:, 1:], jnp.ones((N, 1), jnp.float32)], axis=1)                      # (N, T)
    # Inclusive-prefix 0/1 mask, exact in bf16; loaded once (constant block index).
    incl = (jnp.arange(T)[:, None] <= jnp.arange(T)[None, :]).astype(jnp.bfloat16)  # (T, T)

    # ---- prep kernel: Eq. 3 closed form, tiled over row blocks ----------------------
    prep_block = _pick_block_rows(N, 256, align=8)
    n_prep = N // prep_block
    pt = pl.pallas_call(
        functools.partial(_pt_prep_kernel, T=T, epsilon=float(epsilon)),
        out_shape=jax.ShapeDtypeStruct((N, T), jnp.float32),
        grid=(n_prep,),
        in_specs=[
            pl.BlockSpec((T, T), lambda i: (0, 0)),            # triangular mask (resident)
            pl.BlockSpec((prep_block, T), lambda i: (i, 0)),   # delta rows
            pl.BlockSpec((prep_block, T), lambda i: (i, 0)),   # shifted delta rows
        ],
        out_specs=pl.BlockSpec((prep_block, T), lambda i: (i, 0)),
        compiler_params=pltpu.CompilerParams(
            dimension_semantics=("parallel",),
            vmem_limit_bytes=vmem_limit),
    )(incl, delta, d_next)

    # Earliness orientation: mt[t, n] = pt[n, t] * (1 - n/T).  Cheap fused XLA
    # transpose+scale of the small f32 pt output (review-sanctioned; avoids an
    # in-kernel transpose and a second prefix product).
    mt = jnp.transpose(pt, (1, 0)) * (
        1.0 - jnp.arange(N, dtype=jnp.float32) / T)[None, :]                         # (T, N)

    # ---- streaming kernel: tiled over the shared row axis, fully block-parallel -----
    itemsize = jnp.dtype(stream_dtype).itemsize
    align = 32 if itemsize == 1 else (16 if itemsize == 2 else 8)
    # VMEM byte budget per pipeline buffer (double-buffered => ~2x this), so the
    # default-sized blocks fit v5e/v6e/v7x with the explicit 32 MiB scoped limit.
    row_bytes = C * N * itemsize + 4 * N + 4 * T + 4 * N
    max_rows_vmem = max(align, (12 * 1024 * 1024) // max(row_bytes, 1))
    block = _pick_block_rows(rows, min(block_rows, max_rows_vmem), align)
    if rows // block == 1 and rows % (2 * align) == 0:
        # Ensure >= 2 blocks so the "parallel" axis shards across both v7x TCs.
        block = _pick_block_rows(rows, rows // 2, align)
    nblocks = rows // block

    partials = pl.pallas_call(
        functools.partial(_stream_kernel, num_classes=C),
        out_shape=jax.ShapeDtypeStruct((nblocks, 8, 128), jnp.float32),
        grid=(nblocks,),
        in_specs=[
            pl.BlockSpec((C, block, N), lambda i: (0, i, 0)),   # log-probs, lane-dense
            pl.BlockSpec((block, N), lambda i: (i, 0)),         # permuted targets
            pl.BlockSpec((block, T), lambda i: (i, 0)),         # Pt rows
            pl.BlockSpec((block, N), lambda i: (i, 0)),         # weighted Pt^T rows
        ],
        out_specs=pl.BlockSpec((1, 8, 128), lambda i: (i, 0, 0)),
        compiler_params=pltpu.CompilerParams(
            dimension_semantics=("parallel",),
            vmem_limit_bytes=vmem_limit),
    )(l_ctn, yp, pt, mt)

    class_sum = jnp.sum(partials[:, 0, 0])
    earl_sum = jnp.sum(partials[:, 1, 0])
    # .sum(1).mean(0) over an (R, R) tensor == total / T   (R == T == N)
    return (alpha * class_sum - (1.0 - alpha) * earl_sum) / T


def _reference_loss(log_probs, deltas, y_true, alpha=0.5, epsilon=10.0):
    """Pure-JAX transcription of the PyTorch forward (T == N), for validation."""
    T, N, C = log_probs.shape
    yp = y_true.T                                                      # (T, N)
    budget = jnp.ones((N,), jnp.float32)
    pts = []
    for t in range(1, T):
        pt = deltas[:, t] * budget
        budget = budget - pt
        pts.append(pt)
    pts.append(budget)
    Pt = jnp.stack(pts, axis=-1) + epsilon / T                         # (N, T)
    tmat = jnp.broadcast_to(jnp.arange(T, dtype=jnp.float32)[:, None], (T, N))
    G = jnp.take_along_axis(log_probs, yp[:, :, None], axis=2)[:, :, 0]  # (T, N)
    y_haty = jnp.exp(jnp.reshape(G, (N, T))).T       # masked_select.view(N,T).exp().permute(1,0)
    earliness_reward = (Pt * y_haty * (1.0 - tmat / T)).sum(1).mean(0)
    cross_entropy = -G                                                 # NLLLoss(reduction='none')
    classification_loss = (cross_entropy * Pt).sum(1).mean(0)
    return alpha * classification_loss - (1.0 - alpha) * earliness_reward


if __name__ == "__main__":
    T, N, C = 16, 16, 6            # T == N required by the reference module
    key = jax.random.PRNGKey(0)
    k1, k2, k3 = jax.random.split(key, 3)

    logits = jax.random.normal(k1, (T, N, C), dtype=jnp.float32)
    log_class_probabilities = jax.nn.log_softmax(logits, axis=-1)       # (T, N, C)
    probability_stopping = jax.random.uniform(k2, (N, T), dtype=jnp.float32)  # (N, T)
    y_true = jax.random.randint(k3, (N, T), 0, C, dtype=jnp.int32)      # (N, T)

    # Exact-path check: stream in f32 with a multi-block grid; compare tightly
    # against the pure-JAX reference.
    loss_f32 = early_reward_loss(log_class_probabilities, probability_stopping, y_true,
                                 stream_dtype=jnp.float32, block_rows=8)
    loss_f32 = jax.block_until_ready(loss_f32)
    ref_f32 = jax.block_until_ready(
        _reference_loss(log_class_probabilities, probability_stopping, y_true))
    if not bool(jnp.allclose(loss_f32, ref_f32, rtol=1e-3, atol=1e-3)):
        raise AssertionError(f"f32 Pallas loss {loss_f32} != reference {ref_f32}")

    # Default (bf16-streamed) path: compare against the reference evaluated on the
    # same bf16-rounded log-probs the kernel consumes.
    loss = early_reward_loss(log_class_probabilities, probability_stopping, y_true)
    loss = jax.block_until_ready(loss)
    lp_bf16 = log_class_probabilities.astype(jnp.bfloat16).astype(jnp.float32)
    ref_bf16 = jax.block_until_ready(
        _reference_loss(lp_bf16, probability_stopping, y_true))
    if not bool(jnp.allclose(loss, ref_bf16, rtol=2e-3, atol=2e-3)):
        raise AssertionError(f"bf16 Pallas loss {loss} != reference {ref_bf16}")

    print("KERNEL_OK")
</pallas_src>

<mosaic_0001>
module attributes {stable_mosaic.version = 11 : i64} {
  func.func @_pt_prep_kernel(%arg0: i32, %arg1: memref<16x16xbf16, #tpu.memory_space<vmem>>, %arg2: memref<16x16xf32, #tpu.memory_space<vmem>>, %arg3: memref<16x16xf32, #tpu.memory_space<vmem>>, %arg4: memref<16x16xf32, #tpu.memory_space<vmem>>) attributes {dimension_semantics = [#tpu.dimension_semantics<parallel>], iteration_bounds = array<i64: 1>, scalar_prefetch = 0 : i64, scratch_operands = 0 : i64, tpu.core_type = #tpu.core_type<tc>, window_params = [{pipeline_mode = #tpu.pipeline_mode<synchronous>, transform_indices = @transform_0, window_bounds = array<i64: 16, 16>}, {transform_indices = @transform_1, window_bounds = array<i64: 16, 16>}, {transform_indices = @transform_2, window_bounds = array<i64: 16, 16>}, {transform_indices = @transform_3, window_bounds = array<i64: 16, 16>}]} {
    %c0 = arith.constant 0 : index
    %c0_0 = arith.constant 0 : index
    %0 = vector.load %arg2[%c0, %c0_0] : memref<16x16xf32, #tpu.memory_space<vmem>>, vector<16x16xf32>
    %1 = tpu.iota {dimensions = array<i32: 1>} : vector<16x16xi32>
    %c0_i32 = arith.constant 0 : i32
    %2 = vector.broadcast %c0_i32 : i32 to vector<16x16xi32>
    %3 = arith.cmpi eq, %1, %2 : vector<16x16xi32>
    %cst = arith.constant 1.000000e+00 : f32
    %4 = vector.broadcast %cst : f32 to vector<16x16xf32>
    %5 = arith.subf %4, %0 : vector<16x16xf32>
    %cst_1 = arith.constant 1.000000e+00 : f32
    %6 = vector.broadcast %cst_1 : f32 to vector<16x16xf32>
    %7 = arith.select %3, %6, %5 : vector<16x16xi1>, vector<16x16xf32>
    %cst_2 = arith.constant 1.000000e-30 : f32
    %8 = vector.broadcast %cst_2 : f32 to vector<16x16xf32>
    %9 = arith.maximumf %7, %8 : vector<16x16xf32>
    %10 = math.log %9 : vector<16x16xf32>
    %11 = arith.truncf %10 : vector<16x16xf32> to vector<16x16xbf16>
    %12 = arith.extf %11 : vector<16x16xbf16> to vector<16x16xf32>
    %13 = arith.subf %10, %12 : vector<16x16xf32>
    %14 = arith.truncf %13 : vector<16x16xf32> to vector<16x16xbf16>
    %c0_3 = arith.constant 0 : index
    %c0_4 = arith.constant 0 : index
    %15 = vector.load %arg1[%c0_3, %c0_4] : memref<16x16xbf16, #tpu.memory_space<vmem>>, vector<16x16xbf16>
    %cst_5 = arith.constant dense<0.000000e+00> : vector<16x16xf32>
    %16 = tpu.matmul %11, %15, %cst_5 {dimension_numbers = #tpu.dot_dimension_numbers<[1], [0], [0], [1], [0, 0, 1, 1], [], []>} : vector<16x16xbf16>, vector<16x16xbf16>, vector<16x16xf32> -> vector<16x16xf32>
    %cst_6 = arith.constant dense<0.000000e+00> : vector<16x16xf32>
    %17 = tpu.matmul %14, %15, %cst_6 {dimension_numbers = #tpu.dot_dimension_numbers<[1], [0], [0], [1], [0, 0, 1, 1], [], []>} : vector<16x16xbf16>, vector<16x16xbf16>, vector<16x16xf32> -> vector<16x16xf32>
    %18 = arith.addf %16, %17 : vector<16x16xf32>
    %19 = math.exp %18 : vector<16x16xf32>
    %c0_7 = arith.constant 0 : index
    %c0_8 = arith.constant 0 : index
    %20 = vector.load %arg3[%c0_7, %c0_8] : memref<16x16xf32, #tpu.memory_space<vmem>>, vector<16x16xf32>
    %21 = arith.mulf %19, %20 : vector<16x16xf32>
    %cst_9 = arith.constant 6.250000e-01 : f32
    %22 = vector.broadcast %cst_9 : f32 to vector<16x16xf32>
    %23 = arith.addf %21, %22 : vector<16x16xf32>
    %c0_10 = arith.constant 0 : index
    %c0_11 = arith.constant 0 : index
    %24 = vector.load %arg4[%c0_10, %c0_11] : memref<16x16xf32, #tpu.memory_space<vmem>>, vector<16x16xf32>
    tpu.vector_store %arg4[%c0_10, %c0_11], %23 {strides = array<i32>} : memref<16x16xf32, #tpu.memory_space<vmem>>, vector<16x16xf32>,
    return
  }
  func.func @transform_0(%arg0: i32) -> (i32, i32) {
    %c0_i32 = arith.constant 0 : i32
    %c0_i32_0 = arith.constant 0 : i32
    %c0_i32_1 = arith.constant 0 : i32
    return %c0_i32, %c0_i32_0 : i32, i32
  }
  func.func @transform_1(%arg0: i32) -> (i32, i32) {
    %c0_i32 = arith.constant 0 : i32
    %c0_i32_0 = arith.constant 0 : i32
    return %arg0, %c0_i32 : i32, i32
  }
  func.func @transform_2(%arg0: i32) -> (i32, i32) {
    %c0_i32 = arith.constant 0 : i32
    %c0_i32_0 = arith.constant 0 : i32
    return %arg0, %c0_i32 : i32, i32
  }
  func.func @transform_3(%arg0: i32) -> (i32, i32) {
    %c0_i32 = arith.constant 0 : i32
    %c0_i32_0 = arith.constant 0 : i32
    return %arg0, %c0_i32 : i32, i32
  }
}

</mosaic_0001>

<bundles_post_ra>
// kernel: tpu_custom_call.1
= control target key start
LH: loop header
LB: loop body
LE: loop exit
PB: predicated region body
PF: predicated region fallthrough
CT: control target
= control target key end

     0   :  { %8 = vsyncpa [#allocation3], 0  ;;  %s343_s0 = inlined_call_operand.hbm [shape: bf16[16,16], index: 0, kind: input, shape index: {}]   ;;  %s344_s1 = inlined_call_operand.hbm [shape: f32[16,16], index: 1, kind: input, shape index: {}]   ;;  %s345_s2 = inlined_call_operand.hbm [shape: f32[16,16], index: 2, kind: input, shape index: {}]   ;;  %s346_s3 = inlined_call_operand.hbm [shape: f32[16,16], index: 3, kind: output, shape index: {}]  }
   0x1   :  { %9 = vsyncpa [#allocation6], 0  ;;  %s28_s14 = sshll.u32 %s344_s1, 4  ;;  %s29_s14 = int_to_ptr.hbm [resolvable:$true] %s28_s14 }
   0x2   :  { %10 = vsyncpa [#allocation4], 0  ;;  %s290_s15 = smov [#allocation5]   ;;  %s15_s19 = sshll.u32 %s343_s0, 4  ;;  %s16_s19 = int_to_ptr.hbm [resolvable:$true] %s15_s19 }
   0x3   :  { %s30_s16 = sshll.u32 %s290_s15, 4  ;;  %s291_s20 = smov 128   ;;  %s31_s16 = int_to_ptr.vmem [resolvable:$true] %s30_s16 }
   0x4   :  { %s292_s21 = smov 8   ;;  %s293_s22 = smov [#allocation2]  }
   0x5   :  { %36 = dma.hbm_to_vmem [thread:$0]  %s29_s14, 256, %s31_s16, [#allocation6], %s291_s20, %s291_s20, %s292_s21  }
   0x6   :  { %s17_s23 = sshll.u32 %s293_s22, 4  ;;  %s294_s1 = smov 64   ;;  %s18_s23 = int_to_ptr.vmem [resolvable:$true] %s17_s23 }
   0x7   :  { %s295_s24 = smov 4   ;;  %s41_s27 = sshll.u32 %s345_s2, 4  ;;  %s42_s27 = int_to_ptr.hbm [resolvable:$true] %s41_s27 }
   0x8   :  { %23 = dma.hbm_to_vmem [thread:$0]  %s16_s19, 128, %s18_s23, [#allocation3], %s294_s1, %s294_s1, %s295_s24  }
   0x9   :  { %s296_s28 = smov [#allocation7]  }
   0xa   :  { %s43_s0 = sshll.u32 %s296_s28, 4  ;;  %s44_s0 = int_to_ptr.vmem [resolvable:$true] %s43_s0 }
   0xb   :  { %49 = dma.hbm_to_vmem [thread:$0]  %s42_s27, 256, %s44_s0, [#allocation6], %s291_s20, %s291_s20, %s292_s21  }
   0xc   :  { %284 = dma.done.wait [#allocation3], 128  }
   0xd   :  { %285 = vsyncadd [#allocation3], 4294967168 }
   0xe   :  { %286 = dma.done.wait [#allocation6], 512  }
   0xf   :  { %287 = vsyncadd [#allocation6], 4294966784  ;;  %v65_v0 = vlaneseq  ;;  %v171_v2 = vld [vmem:[#allocation2] sm:$0xff]  ;;  %v63_v3 = vld [vmem:[#allocation5] sm:$0xff]  ;;  %vm93_vm1 = vcmask 130048   ;;  %s297_s2 = smov [#allocation8]  }
  0x10   :  { %v64_v4 = vld [vmem:[#allocation5 + $0x8] sm:$0xff]  ;;  %v68_v5 = vsub.f32 1.0, %v63_v3  ;;  %126 = vmatpush.bf16.msra.mxu1 %v171_v2  ;;  %104 = vmatpush.bf16.msra.mxu0 %v171_v2  ;;  %v137_v31 = vld [vmem:[#allocation7] sm:$0xff]  ;;  %v138_v37 = vld [vmem:[#allocation7 + $0x8] sm:$0xff]  ;;  %s149_s29 = sshll.u32 %s297_s2, 4  ;;  %s151_s5 = sshll.u32 %s346_s3, 4  ;;  %s150_s29 = int_to_ptr.vmem [resolvable:$true] %s149_s29  ;;  %s152_s5 = int_to_ptr.hbm [resolvable:$true] %s151_s5 }
  0x11   :  { %v66_v1 = vand.u32 127, %v65_v0  ;;  %v69_v6 = vsub.f32 1.0, %v64_v4 }
  0x13   :  { %vm67_vm0 = vcmp.eq.s32.totalorder %v66_v1, 0 }
  0x14   :  { %v70_v7 = vsel %vm67_vm0, 1.0, %v68_v5  ;;  %v71_v8 = vsel %vm67_vm0, 1.0, %v69_v6 }
  0x15   :  { %v72_v9 = vmax.f32 %v70_v7, 1e-30  ;;  %v73_v10 = vmax.f32 %v71_v8, 1e-30 }
  0x17   :  { %180 = vlog2.f32 %v72_v9 }
  0x18   :  { %182 = vlog2.f32 %v73_v10 }
  0x1d   :  { %v181_v11 = vpop.eup %180 }
  0x1e   :  { %v183_v12 = vpop.eup %182  ;;  %v75_v13 = vmul.f32 0.6931472, %v181_v11 }
  0x1f   :  { %v77_v14 = vmul.f32 0.6931472, %v183_v12 }
  0x20   :  { %v78_v15 = vpack.c.bf16 %v75_v13, %v75_v13 }
  0x21   :  { %v79_v16 = vpack.c.bf16 %v77_v14, %v77_v14 }
  0x22   :  { %v113_v17 = vunpack.c.l.b16 %v78_v15  ;;  %v80_v18 = vunpack.c.l.bf16 %v78_v15 }
  0x23   :  { %v114_v19 = vunpack.c.l.b16 %v79_v16  ;;  %v81_v20 = vunpack.c.l.bf16 %v79_v16 }
  0x24   :  { %v82_v21 = vsub.f32 %v75_v13, %v80_v18 }
  0x25   :  { %v115_v22 = vpack.c.b16 %v114_v19, %v113_v17  ;;  %v83_v23 = vsub.f32 %v77_v14, %v81_v20 }
  0x27   :  { %170 = vmatmul.msk.bf16.vlgmr.msra.gmra.mxu1 %vm93_vm1, %v115_v22  ;;  %v84_v24 = vpack.c.bf16 %v83_v23, %v82_v21 }
  0x29   :  { %169 = vmatmul.msk.bf16.vlgmr.msra.gmra.mxu0 %vm93_vm1, %v84_v24 }
  0xa4   :  { %v128_v25 = vpop.f32.mrf.mxu1 }
  0xa6   :  { %v106_v26 = vpop.f32.mrf.mxu0 }
  0xa7   :  { %v129_v27 = vadd.f32 %v128_v25, %v106_v26 }
  0xa9   :  { %v133_v28 = vmul.f32 1.442695, %v129_v27 }
  0xab   :  { %184 = vpow2.f32 %v133_v28 }
  0xac   :  { %v130_v29 = vpop.f32.mrf.mxu1 }
  0xae   :  { %v108_v30 = vpop.f32.mrf.mxu0 }
  0xaf   :  { %v131_v32 = vadd.f32 %v130_v29, %v108_v30 }
  0xb1   :  { %v185_v33 = vpop.eup %184  ;;  %v135_v34 = vmul.f32 1.442695, %v131_v32 }
  0xb2   :  { %v139_v35 = vmul.f32 %v185_v33, %v137_v31 }
  0xb3   :  { %186 = vpow2.f32 %v135_v34 }
  0xb4   :  { %v141_v36 = vadd.f32 0.625, %v139_v35 }
  0xb6   :  { %143 = vst.msk [vmem:[#allocation8] sm:$0xff] %vm93_vm1, %v141_v36 }
  0xb9   :  { %v187_v38 = vpop.eup %186 }
  0xba   :  { %v140_v39 = vmul.f32 %v187_v38, %v138_v37 }
  0xbc   :  { %v142_v40 = vadd.f32 0.625, %v140_v39 }
  0xbe   :  { %144 = vst.msk [vmem:[#allocation8 + $0x8] sm:$0xff] %vm93_vm1, %v142_v40 }
  0xbf   :  { %157 = dma.vmem_to_hbm [thread:$0]  %s150_s29, 256, %s152_s5, [#allocation4], %s291_s20, %s291_s20, %s292_s21  }
  0xc0   :  { %288 = dma.done.wait [#allocation4], 256  }
  0xc1   :  { %289 = vsyncadd [#allocation4], 4294967040 }
  0xc2   :  { %162 = vsyncpa [#allocation3], 1 }
  0xc3   :  { %163 = vsyncpa [#allocation6], 1 }
  0xc4   :  { %164 = vsyncpa [#allocation4], 1 }

</bundles_post_ra>
